<compile_context>
chip_gen: v6e
topology: v6e:2x2x1
jax: 0.10.0
libtpu: 0.0.40
codegen_flags: <defaults>
</compile_context>

<pallas_src>
import numpy as np

import jax
import jax.numpy as jnp
from jax import lax
from jax.experimental import pallas as pl
from jax.experimental.pallas import tpu as pltpu

# ----------------------------------------------------------------------------
# Model hyper-parameters (defaults of SelfAttentionLanguageModel.__init__ and
# vocab derived from the module-level `text` string, as in .prep()).
# ----------------------------------------------------------------------------
TEXT = ('a quick brown fox jumps over the lazy dog.\n lazy dog and a quick '
        'brown fox.\nthe dog is lazy and the fox jumps quickly.\na fox jumps '
        'over the dog because he is lazy.\ndog is lazy and fox is brown. she '
        'quickly jumps over the lazy dog.')

BATCH_SIZE = 4
INPUT_LENGTH = 8                       # T
EMBED_SIZE = 16                        # E
SA_HEAD_SIZE = 8                       # H
VOCAB_SIZE = len(sorted(set(TEXT)))    # V (= 27)
LANE = 128
V_PAD = ((VOCAB_SIZE + LANE - 1) // LANE) * LANE   # lane-dense logits width


# ----------------------------------------------------------------------------
# Kernel: one invocation, all B*T tokens at once.
# ----------------------------------------------------------------------------
def sa_lm_kernel(ids_ref, emb_ref, wk_ref, wq_ref, wv_ref, wo_ref, bo_ref,
                 mask_ref, logits_ref):
    """ids_ref:    (BT, 1)   int32 token ids
    emb_ref:    (V, E)    embedding table (f32)
    wk_ref:     (E, H)    K projection weight
    wq_ref:     (E, H)    Q projection weight, 1/sqrt(H) scale pre-folded
    wv_ref:     (E, H)    V projection weight
    wo_ref:     (H, VPAD) sa_head -> vocab weight, lane-padded
    bo_ref:     (1, VPAD) sa_head -> vocab bias, lane-padded
    mask_ref:   (BT, BT)  precomputed block-diagonal lower-triangular 1/0 mask
    logits_ref: (BT, VPAD) output logits (lane-dense, padded vocab)
    """
    bt = ids_ref.shape[0]
    vocab = emb_ref.shape[0]

    # ---- embedding lookup as a one-hot matmul (in-kernel gather) ----
    ids = ids_ref[...]                                               # (BT, 1)
    vocab_iota = lax.broadcasted_iota(jnp.int32, (bt, vocab), 1)
    onehot = (ids == vocab_iota).astype(jnp.float32)                 # (BT, V)
    x = jnp.dot(onehot, emb_ref[...],
                preferred_element_type=jnp.float32)                  # (BT, E)

    # ---- K/Q/V projections: three tiny lane-aligned dots (no lane slices) --
    k = jnp.dot(x, wk_ref[...], preferred_element_type=jnp.float32)  # (BT, H)
    q = jnp.dot(x, wq_ref[...], preferred_element_type=jnp.float32)  # scaled
    v = jnp.dot(x, wv_ref[...], preferred_element_type=jnp.float32)

    # ---- batched causal attention over the flattened tokens ----
    # contract last dims directly (no explicit k.T transpose)
    scores = lax.dot_general(q, k, (((1,), (1,)), ((), ())),
                             preferred_element_type=jnp.float32)     # (BT,BT)

    # Faithful to PyTorch: autocorrs = tril(autocorrs); masked_fill(==0, -inf)
    # (mask is 1.0 inside each batch's lower triangle, 0.0 elsewhere).
    tril = scores * mask_ref[...]
    masked = jnp.where(tril == jnp.float32(0.0), jnp.float32(-jnp.inf), tril)

    # Row-wise numerically-stable softmax; masked / cross-batch entries get
    # weight exp(-inf) = 0, so they contribute nothing.
    m = jnp.max(masked, axis=-1, keepdims=True)
    e = jnp.exp(masked - m)
    denom = jnp.sum(e, axis=-1, keepdims=True)
    attn = e * pl.reciprocal(denom, approx=True)     # EUP slot, VALU-free

    out = jnp.dot(attn, v, preferred_element_type=jnp.float32)       # (BT, H)

    # ---- projection to (lane-dense, padded) vocab logits ----
    logits_ref[...] = (jnp.dot(out, wo_ref[...],
                               preferred_element_type=jnp.float32)
                       + bo_ref[...])


# ----------------------------------------------------------------------------
# One-time prep (NOT in the per-call hot path).
# ----------------------------------------------------------------------------
def prepare_model(params, batch_size, input_length):
    """Casts / pads / folds everything once:
      * f32 casts of all weights,
      * 1/sqrt(H) attention scale folded into wq,
      * wo / bo padded to a lane-dense (·, 128) layout (pad lanes are 0),
      * block-diagonal causal mask for the flattened B*T tokens constant-folded
        with numpy.
    """
    head = params['wq'].shape[1]
    vocab = params['wo'].shape[1]
    scale = np.float32(head) ** np.float32(-0.5)

    emb = params['token_embeddings'].astype(jnp.float32)              # (V, E)
    wk = params['wk'].astype(jnp.float32)                             # (E, H)
    wq_s = params['wq'].astype(jnp.float32) * scale                   # (E, H)
    wv = params['wv'].astype(jnp.float32)                             # (E, H)
    wo_p = jnp.pad(params['wo'].astype(jnp.float32),
                   ((0, 0), (0, V_PAD - vocab)))                      # (H, VPAD)
    bo_p = jnp.pad(params['bo'].astype(jnp.float32),
                   ((0, 0), (0, V_PAD - vocab)))                      # (1, VPAD)

    bt = batch_size * input_length
    r = np.arange(bt)
    keep = (((r[:, None] // input_length) == (r[None, :] // input_length))
            & (r[:, None] >= r[None, :]))
    mask = jnp.asarray(keep.astype(np.float32))                       # (BT, BT)

    return {'emb': emb, 'wk': wk, 'wq_s': wq_s, 'wv': wv,
            'wo_p': wo_p, 'bo_p': bo_p, 'mask': mask}


def prepare_ids(in_ids):
    """(B, T) int -> (B*T, 1) int32, done once outside the hot path."""
    b, t = in_ids.shape
    return in_ids.reshape(b * t, 1).astype(jnp.int32)


# ----------------------------------------------------------------------------
# Hot path: one gridless pallas_call, lane-padded logits out.
# ----------------------------------------------------------------------------
@jax.jit
def self_attention_lm_forward_padded(ids_col, prep):
    """Returns (B*T, V_PAD) f32 logits; columns >= VOCAB_SIZE are exactly 0."""
    bt = ids_col.shape[0]
    vmem = pl.BlockSpec(memory_space=pltpu.MemorySpace.VMEM)
    return pl.pallas_call(
        sa_lm_kernel,
        out_shape=jax.ShapeDtypeStruct((bt, V_PAD), jnp.float32),
        in_specs=[vmem] * 8,      # whole arrays in VMEM, no grid, no pipeline
        out_specs=vmem,
    )(ids_col, prep['emb'], prep['wk'], prep['wq_s'], prep['wv'],
      prep['wo_p'], prep['bo_p'], prep['mask'])


def unpad_logits(logits_pad, batch_size, input_length, vocab_size):
    """Verification-path only: recover the module's (B, T, V) logits shape."""
    return logits_pad[:, :vocab_size].reshape(batch_size, input_length,
                                              vocab_size)


# ----------------------------------------------------------------------------
# Pure-JAX reference mirroring the PyTorch module (for verification only).
# ----------------------------------------------------------------------------
def self_attention_lm_reference(in_ids, params):
    emb = params['token_embeddings']
    x = jnp.take(emb, in_ids, axis=0)                        # (B, T, E)
    k = x @ params['wk']
    q = x @ params['wq']
    v = x @ params['wv']
    h = params['wk'].shape[1]
    scores = jnp.einsum('btd,bsd->bts', q, k) * (h ** -0.5)
    t = in_ids.shape[1]
    tri = jnp.tril(jnp.ones((t, t), bool))
    scores = jnp.where(tri[None], scores, 0.0)               # torch.tril
    scores = jnp.where(scores == 0.0, -jnp.inf, scores)      # masked_fill(==0)
    attn = jax.nn.softmax(scores, axis=-1)
    out = jnp.einsum('bts,bsd->btd', attn, v)
    return out @ params['wo'] + params['bo']


# ----------------------------------------------------------------------------
# Deterministic parameter init matching the module's shapes.
# ----------------------------------------------------------------------------
def init_params(key):
    k_emb, k_k, k_q, k_v, k_o, k_b = jax.random.split(key, 6)

    # nn.Embedding(vocab_size, embed_size): N(0, 1)
    emb = jax.random.normal(k_emb, (VOCAB_SIZE, EMBED_SIZE), jnp.float32)

    # nn.Linear(in, out): uniform(-1/sqrt(in), 1/sqrt(in)); stored as (in, out)
    # so the kernel does x @ W.
    def linear_w(k, fan_in, fan_out):
        bound = 1.0 / (fan_in ** 0.5)
        return jax.random.uniform(k, (fan_in, fan_out), jnp.float32,
                                  minval=-bound, maxval=bound)

    wk = linear_w(k_k, EMBED_SIZE, SA_HEAD_SIZE)
    wq = linear_w(k_q, EMBED_SIZE, SA_HEAD_SIZE)
    wv = linear_w(k_v, EMBED_SIZE, SA_HEAD_SIZE)
    wo = linear_w(k_o, SA_HEAD_SIZE, VOCAB_SIZE)
    bo_bound = 1.0 / (SA_HEAD_SIZE ** 0.5)
    bo = jax.random.uniform(k_b, (1, VOCAB_SIZE), jnp.float32,
                            minval=-bo_bound, maxval=bo_bound)

    return {'token_embeddings': emb, 'wk': wk, 'wq': wq, 'wv': wv,
            'wo': wo, 'bo': bo}


if __name__ == "__main__":
    key = jax.random.PRNGKey(0)
    k_params, k_ids = jax.random.split(key)

    params = init_params(k_params)
    in_ids = jax.random.randint(k_ids, (BATCH_SIZE, INPUT_LENGTH),
                                0, VOCAB_SIZE, dtype=jnp.int32)

    # One-time prep, hoisted out of the per-call forward path.
    prep = prepare_model(params, BATCH_SIZE, INPUT_LENGTH)
    ids_col = prepare_ids(in_ids)

    # Hot path: single pallas_call, lane-padded logits.
    logits_pad = self_attention_lm_forward_padded(ids_col, prep)
    logits_pad = jax.block_until_ready(logits_pad)

    assert logits_pad.shape == (BATCH_SIZE * INPUT_LENGTH, V_PAD)
    assert logits_pad.dtype == jnp.float32
    # Padded vocab lanes are exactly zero (wo/bo padding is zero).
    assert bool(jnp.all(logits_pad[:, VOCAB_SIZE:] == 0.0))

    # Verification path only: recover the module's (B, T, V) logits.
    logits = unpad_logits(logits_pad, BATCH_SIZE, INPUT_LENGTH, VOCAB_SIZE)
    assert logits.shape == (BATCH_SIZE, INPUT_LENGTH, VOCAB_SIZE)

    ref = jax.block_until_ready(self_attention_lm_reference(in_ids, params))
    assert jnp.allclose(logits, ref, rtol=1e-2, atol=1e-2, equal_nan=True), \
        "kernel output mismatch vs reference"

    # TODO(synk): cross-entropy loss branch (target != None) left in plain JAX
    # land; the module's target=None path returns (logits, None), which is what
    # this kernel reproduces.
    print("KERNEL_OK")
</pallas_src>

<mosaic_0001>
module attributes {stable_mosaic.version = 11 : i64} {
  func.func @sa_lm_kernel(%arg0: memref<32x1xi32, #tpu.memory_space<vmem>>, %arg1: memref<29x16xf32, #tpu.memory_space<vmem>>, %arg2: memref<16x8xf32, #tpu.memory_space<vmem>>, %arg3: memref<16x8xf32, #tpu.memory_space<vmem>>, %arg4: memref<16x8xf32, #tpu.memory_space<vmem>>, %arg5: memref<8x128xf32, #tpu.memory_space<vmem>>, %arg6: memref<1x128xf32, #tpu.memory_space<vmem>>, %arg7: memref<32x32xf32, #tpu.memory_space<vmem>>, %arg8: memref<32x128xf32, #tpu.memory_space<vmem>>) attributes {dimension_semantics = [], scalar_prefetch = 0 : i64, scratch_operands = 0 : i64, tpu.core_type = #tpu.core_type<tc>} {
    %c0 = arith.constant 0 : index
    %c0_0 = arith.constant 0 : index
    %0 = vector.load %arg0[%c0, %c0_0] : memref<32x1xi32, #tpu.memory_space<vmem>>, vector<32x1xi32>
    %1 = tpu.iota {dimensions = array<i32: 1>} : vector<32x29xi32>
    %2 = vector.broadcast %0 : vector<32x1xi32> to vector<32x29xi32>
    %3 = arith.cmpi eq, %2, %1 : vector<32x29xi32>
    %4 = arith.extui %3 : vector<32x29xi1> to vector<32x29xi32>
    %5 = arith.sitofp %4 : vector<32x29xi32> to vector<32x29xf32>
    %c0_1 = arith.constant 0 : index
    %c0_2 = arith.constant 0 : index
    %6 = vector.load %arg1[%c0_1, %c0_2] : memref<29x16xf32, #tpu.memory_space<vmem>>, vector<29x16xf32>
    %cst = arith.constant dense<0.000000e+00> : vector<32x16xf32>
    %7 = tpu.matmul %5, %6, %cst {dimension_numbers = #tpu.dot_dimension_numbers<[1], [0], [0], [1], [0, 0, 1, 1], [], []>} : vector<32x29xf32>, vector<29x16xf32>, vector<32x16xf32> -> vector<32x16xf32>
    %c0_3 = arith.constant 0 : index
    %c0_4 = arith.constant 0 : index
    %8 = vector.load %arg2[%c0_3, %c0_4] : memref<16x8xf32, #tpu.memory_space<vmem>>, vector<16x8xf32>
    %cst_5 = arith.constant dense<0.000000e+00> : vector<32x8xf32>
    %9 = tpu.matmul %7, %8, %cst_5 {dimension_numbers = #tpu.dot_dimension_numbers<[1], [0], [0], [1], [0, 0, 1, 1], [], []>} : vector<32x16xf32>, vector<16x8xf32>, vector<32x8xf32> -> vector<32x8xf32>
    %c0_6 = arith.constant 0 : index
    %c0_7 = arith.constant 0 : index
    %10 = vector.load %arg3[%c0_6, %c0_7] : memref<16x8xf32, #tpu.memory_space<vmem>>, vector<16x8xf32>
    %cst_8 = arith.constant dense<0.000000e+00> : vector<32x8xf32>
    %11 = tpu.matmul %7, %10, %cst_8 {dimension_numbers = #tpu.dot_dimension_numbers<[1], [0], [0], [1], [0, 0, 1, 1], [], []>} : vector<32x16xf32>, vector<16x8xf32>, vector<32x8xf32> -> vector<32x8xf32>
    %c0_9 = arith.constant 0 : index
    %c0_10 = arith.constant 0 : index
    %12 = vector.load %arg4[%c0_9, %c0_10] : memref<16x8xf32, #tpu.memory_space<vmem>>, vector<16x8xf32>
    %cst_11 = arith.constant dense<0.000000e+00> : vector<32x8xf32>
    %13 = tpu.matmul %7, %12, %cst_11 {dimension_numbers = #tpu.dot_dimension_numbers<[1], [0], [0], [1], [0, 0, 1, 1], [], []>} : vector<32x16xf32>, vector<16x8xf32>, vector<32x8xf32> -> vector<32x8xf32>
    %cst_12 = arith.constant dense<0.000000e+00> : vector<32x32xf32>
    %14 = tpu.matmul %11, %9, %cst_12 {dimension_numbers = #tpu.dot_dimension_numbers<[1], [1], [0], [0], [0, 0, 1, 0], [], []>} : vector<32x8xf32>, vector<32x8xf32>, vector<32x32xf32> -> vector<32x32xf32>
    %c0_13 = arith.constant 0 : index
    %c0_14 = arith.constant 0 : index
    %15 = vector.load %arg7[%c0_13, %c0_14] : memref<32x32xf32, #tpu.memory_space<vmem>>, vector<32x32xf32>
    %16 = arith.mulf %14, %15 : vector<32x32xf32>
    %cst_15 = arith.constant 0.000000e+00 : f32
    %17 = vector.broadcast %cst_15 : f32 to vector<32x32xf32>
    %18 = arith.cmpf oeq, %16, %17 : vector<32x32xf32>
    %cst_16 = arith.constant 0xFF800000 : f32
    %19 = vector.broadcast %cst_16 : f32 to vector<32x32xf32>
    %20 = arith.select %18, %19, %16 : vector<32x32xi1>, vector<32x32xf32>
    %cst_17 = arith.constant dense<0xFF800000> : vector<32xf32>
    %21 = vector.multi_reduction <maximumf>, %20, %cst_17 [1] : vector<32x32xf32> to vector<32xf32>
    %22 = vector.shape_cast %21 : vector<32xf32> to vector<32x1xf32>
    %23 = vector.broadcast %22 : vector<32x1xf32> to vector<32x32xf32>
    %24 = arith.subf %20, %23 : vector<32x32xf32>
    %25 = math.exp %24 : vector<32x32xf32>
    %cst_18 = arith.constant dense<0.000000e+00> : vector<32xf32>
    %26 = vector.multi_reduction <add>, %25, %cst_18 [1] : vector<32x32xf32> to vector<32xf32>
    %27 = vector.shape_cast %26 : vector<32xf32> to vector<32x1xf32>
    %28 = tpu.reciprocal %27 {approx = true} : vector<32x1xf32> -> vector<32x1xf32>
    %29 = vector.broadcast %28 : vector<32x1xf32> to vector<32x32xf32>
    %30 = arith.mulf %25, %29 : vector<32x32xf32>
    %cst_19 = arith.constant dense<0.000000e+00> : vector<32x8xf32>
    %31 = tpu.matmul %30, %13, %cst_19 {dimension_numbers = #tpu.dot_dimension_numbers<[1], [0], [0], [1], [0, 0, 1, 1], [], []>} : vector<32x32xf32>, vector<32x8xf32>, vector<32x8xf32> -> vector<32x8xf32>
    %c0_20 = arith.constant 0 : index
    %c0_21 = arith.constant 0 : index
    %32 = vector.load %arg5[%c0_20, %c0_21] : memref<8x128xf32, #tpu.memory_space<vmem>>, vector<8x128xf32>
    %cst_22 = arith.constant dense<0.000000e+00> : vector<32x128xf32>
    %33 = tpu.matmul %31, %32, %cst_22 {dimension_numbers = #tpu.dot_dimension_numbers<[1], [0], [0], [1], [0, 0, 1, 1], [], []>} : vector<32x8xf32>, vector<8x128xf32>, vector<32x128xf32> -> vector<32x128xf32>
    %c0_23 = arith.constant 0 : index
    %c0_24 = arith.constant 0 : index
    %34 = vector.load %arg6[%c0_23, %c0_24] : memref<1x128xf32, #tpu.memory_space<vmem>>, vector<1x128xf32>
    %35 = vector.broadcast %34 : vector<1x128xf32> to vector<32x128xf32>
    %36 = arith.addf %33, %35 : vector<32x128xf32>
    %c0_25 = arith.constant 0 : index
    %c0_26 = arith.constant 0 : index
    %37 = vector.load %arg8[%c0_25, %c0_26] : memref<32x128xf32, #tpu.memory_space<vmem>>, vector<32x128xf32>
    tpu.vector_store %arg8[%c0_25, %c0_26], %36 {strides = array<i32>} : memref<32x128xf32, #tpu.memory_space<vmem>>, vector<32x128xf32>,
    return
  }
}

</mosaic_0001>

<bundles_post_ra>
// kernel: self_attention_lm_forward_padded.1
= control target key start
LH: loop header
LB: loop body
LE: loop exit
PB: predicated region body
PF: predicated region fallthrough
CT: control target
= control target key end

     0   :  { %vm77_vm0 = vcmask 1044480   ;;  %v1043_v2 = vmov 0   ;;  %s1196_s0 = inlined_call_operand.vmem [shape: s32[32,1], index: 0, kind: input, shape index: {}]   ;;  %s1197_s1 = inlined_call_operand.vmem [shape: f32[29,16], index: 1, kind: input, shape index: {}]   ;;  %s1198_s2 = inlined_call_operand.vmem [shape: f32[16,8], index: 2, kind: input, shape index: {}]   ;;  %s1199_s3 = inlined_call_operand.vmem [shape: f32[16,8], index: 3, kind: input, shape index: {}]   ;;  %s1200_s4 = inlined_call_operand.vmem [shape: f32[16,8], index: 4, kind: input, shape index: {}]   ;;  %s1201_s5 = inlined_call_operand.vmem [shape: f32[8,128], index: 5, kind: input, shape index: {}]   ;;  %s1202_s6 = inlined_call_operand.vmem [shape: f32[1,128], index: 6, kind: input, shape index: {}]   ;;  %s1203_s7 = inlined_call_operand.vmem [shape: f32[32,32], index: 7, kind: input, shape index: {}]   ;;  %s1204_s8 = inlined_call_operand.hbm [shape: f32[32,128], index: 8, kind: output, shape index: {}]  }
   0x1   :  { %v32_v0 = vld [vmem:[%s1196_s0 + $0x10] sm:$0xff]  ;;  %v30_v1 = vld [vmem:[%s1196_s0] sm:$0xff]  ;;  %1004 = vset.pattern.permute.xlu1 %v1043_v2  ;;  %1003 = vset.pattern.permute.xlu0 %v1043_v2  ;;  %v63_v3 = vld [vmem:[%s1197_s1 + $0x18] sm:$0x1f] }
   0x2   :  { %43 = vperm.xlu1 %1004, %v32_v0   ;;  %37 = vperm.xlu0 %1003, %v30_v1   ;;  %v62_v4 = vld [vmem:[%s1197_s1 + $0x10] sm:$0xff] }
   0x3   :  { %13 = vsyncpa [#allocation3], 0  ;;  %v33_v5 = vld [vmem:[%s1196_s0 + $0x18] sm:$0xff]  ;;  %v31_v6 = vld [vmem:[%s1196_s0 + $0x8] sm:$0xff]  ;;  %918 = vmatprep.subr.msk.mxu0 %vm77_vm0, %v63_v3  ;;  %v34_v9 = vlaneseq  ;;  %vm64_vm1 = vcmask 236544   ;;  %v1044_v13 = vmov 0.0  }
   0x4   :  { %919 = vmatpush3.msk.msra.mxu0 %vm77_vm0, %v63_v3  ;;  %v61_v7 = vld [vmem:[%s1197_s1 + $0x8] sm:$0xff]  ;;  %v60_v8 = vld [vmem:[%s1197_s1] sm:$0xff]  ;;  %vm168_vm6 = vcmask 130048   ;;  %vm440_vm7 = vcmask 64512   ;;  %v553_v47 = vld [vmem:[%s1203_s7 + $0x18] sm:$0xff]  ;;  %vm566_vm8 = vcmask 261120  }
   0x5   :  { %920 = vmatprep.subr.mxu0 %v62_v4  ;;  %v35_v10 = vand.u32 127, %v34_v9  ;;  %v167_v20 = vld [vmem:[%s1198_s2 + $0x8] sm:$0xff]  ;;  %v166_v22 = vld [vmem:[%s1198_s2] sm:$0xff]  ;;  %v552_v51 = vld [vmem:[%s1203_s7 + $0x10] sm:$0xff]  ;;  %s1045_s16 = smov [#allocation2]  }
   0x6   :  { %46 = vperm.xlu1 %1004, %v33_v5   ;;  %40 = vperm.xlu0 %1003, %v31_v6   ;;  %v354_v21 = vld [vmem:[%s1200_s4 + $0x8] sm:$0xff]  ;;  %v353_v23 = vld [vmem:[%s1200_s4] sm:$0xff]  ;;  %s822_s17 = sshll.u32 %s1045_s16, 4  ;;  %s823_s17 = int_to_ptr.vmem [resolvable:$true] %s822_s17 }
   0x7   :  { %921 = vmatpush3.msra.mxu0 %v62_v4  ;;  %932 = vmatprep.subr.mxu1 %v167_v20  ;;  %v267_v24 = vld [vmem:[%s1199_s3 + $0x8] sm:$0xff]  ;;  %v266_v27 = vld [vmem:[%s1199_s3] sm:$0xff]  ;;  %s1021_s18 = scalar_lea.vmem %s823_s17, 512  ;;  %p1026_p1 = scmp.lt.s32.totalorder %s823_s17, %s823_s17 }
   0x8   :  { %922 = vmatprep.subr.mxu0 %v61_v7  ;;  %933 = vmatpush3.msra.mxu1 %v167_v20  ;;  %v551_v42 = vld [vmem:[%s1203_s7 + $0x8] sm:$0xff]  ;;  %v550_v44 = vld [vmem:[%s1203_s7] sm:$0xff]  ;;  %p1022_p0 = scmp.ne.s32.totalorder %s823_s17, %s1021_s18  ;;  %p1027_p2 = scmp.lt.s32.totalorder %s1021_s18, %s1021_s18 }
   0x9   :  { %923 = vmatpush3.msra.mxu0 %v61_v7  ;;  %934 = vmatprep.subr.mxu1 %v166_v22 }
   0xa   :  { %924 = vmatprep.subr.mxu0 %v60_v8  ;;  %935 = vmatpush3.msra.mxu1 %v166_v22  ;;  %p1028_p3 = por %p1027_p2, %p1026_p1 }
   0xb   :  { %925 = vmatpush3.msra.mxu0 %v60_v8  ;;  %942 = vmatprep.subr.mxu1 %v267_v24 }
   0xc   :  { %952 = vmatprep.subr.mxu0 %v354_v21  ;;  %p1029_p4 = pnand %p1028_p3, %p1022_p0 }
  0x7d   :  { %v44_v11 = vpop.permute.xlu1 %43  ;;  %v38_v12 = vpop.permute.xlu0 %37 }
  0x7e   :  { %vm48_vm2 = vcmp.eq.s32.totalorder %v38_v12, %v35_v10  ;;  %vm50_vm3 = vcmp.eq.s32.totalorder %v44_v11, %v35_v10 }
  0x7f   :  { %v833_v14 = vsel %vm48_vm2, 1.0, %v1044_v13  ;;  %v835_v17 = vsel %vm50_vm3, 1.0, %v1044_v13 }
  0x80   :  { %926 = vmatprep.mubr.msk.f32.mxu0 %vm64_vm1, %v833_v14 }
  0x81   :  { %v47_v15 = vpop.permute.xlu1 %46  ;;  %v41_v16 = vpop.permute.xlu0 %40 }
  0x82   :  { %vm49_vm4 = vcmp.eq.s32.totalorder %v41_v16, %v35_v10  ;;  %vm51_vm5 = vcmp.eq.s32.totalorder %v47_v15, %v35_v10 }
  0x83   :  { %v834_v18 = vsel %vm49_vm4, 1.0, %v1044_v13  ;;  %v836_v19 = vsel %vm51_vm5, 1.0, %v1044_v13 }
  0x84   :  { %927 = vmatmul.mubr.msk.f32.vlgmr.msra.gmra.mxu0 %vm64_vm1, %v834_v18  ;;  %v708_v18 = vld [vmem:[%s1201_s5] sm:$0xff] }
  0x85   :  { %929 = vmatprep.mubr.msk.f32.mxu0 %vm64_vm1, %v835_v17  ;;  %953 = vmatpush3.msra.mxu0 %v354_v21 }
  0x86   :  { %954 = vmatprep.subr.mxu0 %v353_v23 }
  0x87   :  { %955 = vmatpush3.msra.mxu0 %v353_v23 }
  0x88   :  { %930 = vmatmul.mubr.msk.f32.gmra.mxu0 %vm64_vm1, %v836_v19 }
 0x144   :  { %v928_v25 = vpop.f32.mrf.mxu0 }
 0x146   :  { %v147_v26 = vpop.f32.mrf.mxu0 }
 0x147   :  { %936 = vmatprep.mubr.msk.f32.mxu1 %vm168_vm6, %v147_v26  ;;  %956 = vmatprep.mubr.msk.f32.mxu0 %vm168_vm6, %v147_v26 }
 0x148   :  { %v931_v28 = vpop.f32.mrf.mxu0  ;;  %937 = vmatmul.mubr.msk.f32.vlgmr.msra.gmra.mxu1 %vm168_vm6, %v928_v25  ;;  %957 = vmatmul.mubr.msk.f32.vlgmr.msra.gmra.mxu0 %vm168_vm6, %v928_v25 }
 0x149   :  { %943 = vmatpush3.msra.mxu1 %v267_v24 }
 0x14a   :  { %v157_v29 = vpop.f32.mrf.mxu0  ;;  %944 = vmatprep.subr.mxu1 %v266_v27 }
 0x14b   :  { %939 = vmatprep.mubr.msk.f32.mxu1 %vm168_vm6, %v157_v29  ;;  %959 = vmatprep.mubr.msk.f32.mxu0 %vm168_vm6, %v157_v29 }
 0x14c   :  { %940 = vmatmul.mubr.msk.f32.gmra.mxu1 %vm168_vm6, %v931_v28  ;;  %960 = vmatmul.mubr.msk.f32.gmra.mxu0 %vm168_vm6, %v931_v28 }
 0x14d   :  { %946 = vmatprep.mubr.msk.f32.mxu1 %vm168_vm6, %v147_v26  ;;  %945 = vmatpush3.msra.mxu1 %v266_v27 }
 0x150   :  { %947 = vmatmul.mubr.msk.f32.vlgmr.msra.gmra.mxu1 %vm168_vm6, %v928_v25 }
 0x151   :  { %949 = vmatprep.mubr.msk.f32.mxu1 %vm168_vm6, %v157_v29 }
 0x154   :  { %950 = vmatmul.mubr.msk.f32.gmra.mxu1 %vm168_vm6, %v931_v28 }
 0x208   :  { %v938_v30 = vpop.f32.mrf.mxu1  ;;  %v958_v31 = vpop.f32.mrf.mxu0 }
 0x20a   :  { %v247_v32 = vpop.f32.mrf.mxu1  ;;  %v421_v33 = vpop.f32.mrf.mxu0 }
 0x20c   :  { %v941_v34 = vpop.f32.mrf.mxu1  ;;  %v961_v35 = vpop.f32.mrf.mxu0 }
 0x20d   :  { %962 = vmatprep.subr.msk.mxu1 %vm440_vm7, %v941_v34  ;;  %976 = vmatprep.subr.mxu0 %v961_v35 }
 0x20e   :  { %v257_v36 = vpop.f32.mrf.mxu1  ;;  %v431_v37 = vpop.f32.mrf.mxu0  ;;  %963 = vmatpush3.xpose.msk.msra.mxu1 %vm440_vm7, %v941_v34  ;;  %977 = vmatpush3.msra.mxu0 %v961_v35  ;;  %v866_v35 = vld [vmem:[%s1202_s6] ss:$0 sm:$0xff] }
 0x20f   :  { %964 = vmatprep.subr.msk.mxu1 %vm440_vm7, %v257_v36  ;;  %978 = vmatprep.subr.mxu0 %v431_v37 }
 0x210   :  { %v948_v38 = vpop.f32.mrf.mxu1  ;;  %979 = vmatpush3.msra.mxu0 %v431_v37 }
 0x211   :  { %980 = vmatprep.subr.mxu0 %v958_v31 }
 0x212   :  { %v334_v39 = vpop.f32.mrf.mxu1  ;;  %965 = vmatpush3.xpose.msk.msra.mxu1 %vm440_vm7, %v257_v36  ;;  %981 = vmatpush3.msra.mxu0 %v958_v31 }
 0x213   :  { %966 = vmatprep.subr.msk.mxu1 %vm440_vm7, %v938_v30  ;;  %970 = vmatprep.mubr.msk.f32.mxu1 %vm440_vm7, %v334_v39 }
 0x214   :  { %982 = vmatprep.subr.mxu0 %v421_v33  ;;  %v951_v40 = vpop.f32.mrf.mxu1 }
 0x215   :  { %983 = vmatpush3.msra.mxu0 %v421_v33 }
 0x216   :  { %967 = vmatpush3.xpose.msk.msra.mxu1 %vm440_vm7, %v938_v30  ;;  %v344_v41 = vpop.f32.mrf.mxu1  ;;  %990 = vmatprep.subr.mxu0 %v708_v18 }
 0x217   :  { %968 = vmatprep.subr.msk.mxu1 %vm440_vm7, %v247_v32 }
 0x21a   :  { %969 = vmatpush3.xpose.msk.msra.mxu1 %vm440_vm7, %v247_v32 }
 0x21d   :  { %971 = vmatmul.mubr.msk.f32.vlgmr.msra.gmra.mxu1 %vm440_vm7, %v948_v38 }
 0x21e   :  { %973 = vmatprep.mubr.msk.f32.mxu1 %vm440_vm7, %v344_v41 }
 0x221   :  { %974 = vmatmul.mubr.msk.f32.gmra.mxu1 %vm440_vm7, %v951_v40 }
 0x2dd   :  { %v972_v43 = vpop.f32.mrf.mxu1 }
 0x2de   :  { %v555_v45 = vmul.f32 %v972_v43, %v551_v42 }
 0x2df   :  { %v531_v46 = vpop.f32.mrf.mxu1 }
 0x2e0   :  { %v554_v48 = vmul.f32 %v550_v44, %v531_v46  ;;  %vm559_vm9 = vcmp.eq.f32.partialorder %v555_v45, 0.0 }
 0x2e1   :  { %v975_v49 = vpop.f32.mrf.mxu1  ;;  %v563_v50 = vsel %vm559_vm9, -inf, %v555_v45 }
 0x2e2   :  { %v557_v52 = vmul.f32 %v975_v49, %v553_v47  ;;  %v570_v53 = vsel %vm566_vm8, %v563_v50, -inf  ;;  %vm558_vm10 = vcmp.eq.f32.partialorder %v554_v48, 0.0 }
 0x2e3   :  { %571 = vmax.xlane.f32.xlu1 %v570_v53  ;;  %v541_v54 = vpop.f32.mrf.mxu1  ;;  %v562_v55 = vsel %vm558_vm10, -inf, %v554_v48 }
 0x2e4   :  { %v556_v56 = vmul.f32 %v552_v51, %v541_v54  ;;  %v567_v57 = vsel %vm566_vm8, %v562_v55, -inf  ;;  %vm561_vm12 = vcmp.eq.f32.partialorder %v557_v52, 0.0 }
 0x2e5   :  { %568 = vmax.xlane.f32.xlu0 %v567_v57  ;;  %v565_v60 = vsel %vm561_vm12, -inf, %v557_v52 }
 0x2e6   :  { %vm560_vm11 = vcmp.eq.f32.partialorder %v556_v56, 0.0  ;;  %v576_v61 = vsel %vm566_vm8, %v565_v60, -inf }
 0x2e7   :  { %v564_v58 = vsel %vm560_vm11, -inf, %v556_v56 }
 0x2e8   :  { %v573_v59 = vsel %vm566_vm8, %v564_v58, -inf }
 0x2e9   :  { %574 = vmax.xlane.f32.xlu0 %v573_v59 }
 0x2ed   :  { %577 = vmax.xlane.f32.xlu0 %v576_v61 }
 0x36c   :  { %v572_v62 = vpop.xlane.xlu1 %571 }
 0x36d   :  { %v580_v63 = vsub.f32 %v563_v50, %v572_v62 }
 0x36e   :  { %v569_v0 = vpop.xlane.xlu0 %568 }
 0x36f   :  { %v585_v1 = vmul.f32 1.442695, %v580_v63  ;;  %v579_v2 = vsub.f32 %v562_v55, %v569_v0 }
 0x371   :  { %1005 = vpow2.f32 %v585_v1  ;;  %v583_v3 = vmul.f32 1.442695, %v579_v2 }
 0x372   :  { %v575_v4 = vpop.xlane.xlu0 %574 }
 0x373   :  { %1007 = vpow2.f32 %v583_v3  ;;  %v581_v5 = vsub.f32 %v564_v58, %v575_v4 }
 0x375   :  { %v587_v6 = vmul.f32 1.442695, %v581_v5 }
 0x376   :  { %v578_v7 = vpop.xlane.xlu0 %577 }
 0x377   :  { %1009 = vpow2.f32 %v587_v6  ;;  %v582_v8 = vsub.f32 %v565_v60, %v578_v7 }
 0x379   :  { %v589_v9 = vmul.f32 1.442695, %v582_v8 }
 0x37b   :  { %1011 = vpow2.f32 %v589_v9 }
 0x37e   :  { %v1006_v10 = vpop.eup %1005 }
 0x37f   :  { %v594_v11 = vsel %vm566_vm8, %v1006_v10, 0.0 }
 0x380   :  { %v1008_v12 = vpop.eup %1007  ;;  %595 = vadd.xlane.f32.xlu0 %v594_v11 }
 0x381   :  { %v591_v13 = vsel %vm566_vm8, %v1008_v12, 0.0 }
 0x382   :  { %592 = vadd.xlane.f32.xlu1 %v591_v13 }
 0x384   :  { %v1010_v14 = vpop.eup %1009 }
 0x385   :  { %v597_v15 = vsel %vm566_vm8, %v1010_v14, 0.0 }
 0x386   :  { %598 = vadd.xlane.f32.xlu1 %v597_v15 }
 0x388   :  { %v1012_v16 = vpop.eup %1011 }
 0x389   :  { %v600_v17 = vsel %vm566_vm8, %v1012_v16, 0.0 }
 0x38a   :  { %601 = vadd.xlane.f32.xlu0 %v600_v17 }
 0x409   :  { %v596_v19 = vpop.xlane.xlu0 %595 }
 0x40a   :  { %1013 = vrcp.f32 %v596_v19 }
 0x40b   :  { %v593_v20 = vpop.xlane.xlu1 %592 }
 0x40c   :  { %1015 = vrcp.f32 %v593_v20 }
 0x40f   :  { %v599_v21 = vpop.xlane.xlu1 %598 }
 0x410   :  { %1017 = vrcp.f32 %v599_v21 }
 0x413   :  { %v602_v22 = vpop.xlane.xlu0 %601 }
 0x414   :  { %1019 = vrcp.f32 %v602_v22 }
 0x417   :  { %v1014_v23 = vpop.eup %1013 }
 0x418   :  { %v608_v26 = vmul.f32 %v1014_v23, %v1006_v10 }
 0x419   :  { %v1016_v24 = vpop.eup %1015 }
 0x41a   :  { %v607_v25 = vmul.f32 %v1016_v24, %v1008_v12 }
 0x41c   :  { %984 = vmatprep.mubr.msk.f32.mxu0 %vm566_vm8, %v607_v25 }
 0x41d   :  { %v1018_v27 = vpop.eup %1017  ;;  %985 = vmatmul.mubr.msk.f32.vlgmr.msra.gmra.mxu0 %vm566_vm8, %v608_v26 }
 0x41e   :  { %v609_v28 = vmul.f32 %v1018_v27, %v1010_v14  ;;  %991 = vmatpush3.msra.mxu0 %v708_v18 }
 0x420   :  { %987 = vmatprep.mubr.msk.f32.mxu0 %vm566_vm8, %v609_v28 }
 0x421   :  { %v1020_v29 = vpop.eup %1019 }
 0x422   :  { %v610_v30 = vmul.f32 %v1020_v29, %v1012_v16 }
 0x424   :  { %988 = vmatmul.mubr.msk.f32.gmra.mxu0 %vm566_vm8, %v610_v30 }
 0x4dd   :  { %v986_v31 = vpop.f32.mrf.mxu0 }
 0x4df   :  { %v689_v32 = vpop.f32.mrf.mxu0 }
 0x4e0   :  { %992 = vmatprep.mubr.msk.f32.mxu0 %vm440_vm7, %v689_v32 }
 0x4e1   :  { %993 = vmatmul.mubr.msk.f32.vlgmr.msra.gmra.mxu0 %vm440_vm7, %v986_v31 }
 0x4e4   :  { %v989_v33 = vpop.f32.mrf.mxu0 }
 0x4e6   :  { %v699_v34 = vpop.f32.mrf.mxu0 }
 0x4e7   :  { %995 = vmatprep.mubr.msk.f32.mxu0 %vm440_vm7, %v699_v34 }
 0x4e8   :  { %996 = vmatmul.mubr.msk.f32.gmra.mxu0 %vm440_vm7, %v989_v33 }
 0x5a1   :  { %v994_v36 = vpop.f32.mrf.mxu0 }
 0x5a2   :  { %v800_v37 = vadd.f32 %v994_v36, %v866_v35 }
 0x5a3   :  { %v794_v38 = vpop.f32.mrf.mxu0 }
 0x5a4   :  { %814 = vst [vmem:[#allocation2 + $0x8] sm:$0xff] %v800_v37  ;;  %v795_v39 = vadd.f32 %v866_v35, %v794_v38 }
 0x5a6   :  { %813 = vst [vmem:[#allocation2] sm:$0xff] %v795_v39 }
 0x5a8   :  { %v997_v40 = vpop.f32.mrf.mxu0 }
 0x5a9   :  { %v810_v41 = vadd.f32 %v997_v40, %v866_v35 }
 0x5aa   :  { %v804_v42 = vpop.f32.mrf.mxu0 }
 0x5ab   :  { %816 = vst [vmem:[#allocation2 + $0x18] sm:$0xff] %v810_v41  ;;  %v805_v43 = vadd.f32 %v866_v35, %v804_v42 }
 0x5ad   :  { %815 = vst [vmem:[#allocation2 + $0x10] sm:$0xff] %v805_v43 }
 0x5ae   :  { %1032 = shalt.err (!%p1029_p4)
}
 0x5af   :  { %s1046_s6 = smov 128   ;;  %s1047_s19 = smov 8  }
 0x5b0   :  { %828 = dma.vmem_to_hbm [thread:$0]  %s823_s17, 512, %s1204_s8, [#allocation3], %s1046_s6, %s1046_s6, %s1047_s19  }
 0x5b1   :  { %1041 = dma.done.wait [#allocation3], 512  }
 0x5b2   :  { %1042 = vsyncadd [#allocation3], 4294966784 }
 0x5b3   :  { %832 = vsyncpa [#allocation3], 1 }

</bundles_post_ra>
